<compile_context>
chip_gen: v7x
topology: tpu7x:2x2x1
jax: 0.10.0
libtpu: 0.0.40
codegen_flags: <defaults>
</compile_context>

<pallas_src>
import math

import jax
import jax.numpy as jnp
import numpy as np
from jax.experimental import pallas as pl
from jax.experimental.pallas import tpu as pltpu

LANE = 128


# ----------------------------------------------------------------------------
# tiling helpers
# ----------------------------------------------------------------------------
def _pick_tile_s(S, R, h_itemsize, h_dbuf_budget_bytes=8 << 20):
    """Largest tS dividing S (multiple of 8, or == S) such that the
    double-buffered hessian block 2*R*tS*128*itemsize fits the budget."""
    cap = max(1, h_dbuf_budget_bytes // (2 * R * LANE * h_itemsize))
    if S <= cap:
        return S
    for t in range(int(cap), 0, -1):
        if S % t == 0 and t % 8 == 0:
            return t
    # TODO(synk): S has no multiple-of-8 divisor under the VMEM cap; fall back
    # to a single (possibly oversized) block rather than re-padding h in HBM.
    return S


# ----------------------------------------------------------------------------
# recon kernel: per-sample quadratic form ||h d^T||^2, tiled over S.
# ----------------------------------------------------------------------------
def _recon_quad_pallas(x3, xh3, h4):
    """x3, xh3: (B, S, 128); h4: (B, R, S, 128).  Returns (B, 1, 128) f32 where
    out[b, 0, :] is the per-sample quadratic form broadcast over lanes."""
    B, S, _ = x3.shape
    R = h4.shape[1]
    h_itemsize = h4.dtype.itemsize
    x_itemsize = x3.dtype.itemsize

    tS = _pick_tile_s(S, R, h_itemsize)
    n_s = S // tS

    def kernel(x_ref, xh_ref, h_ref, out_ref, w_acc):
        j = pl.program_id(1)

        @pl.when(j == 0)
        def _():
            w_acc[...] = jnp.zeros_like(w_acc)

        # cast-in-kernel: inputs arrive in native dtype (bf16/f32), math in f32.
        d = x_ref[0].astype(jnp.float32) - xh_ref[0].astype(jnp.float32)  # (tS,128)
        hv = h_ref[0].astype(jnp.float32)                                 # (R,tS,128)
        # partial contraction over the sublane (s) axis of this tile, keep lanes.
        w_acc[...] += jnp.sum(hv * d[None, :, :], axis=1)                 # (R,128)

        @pl.when(j == pl.num_programs(1) - 1)
        def _():
            v = jnp.sum(w_acc[...], axis=1, keepdims=True)                # (R,1)
            q = jnp.sum(v * v)                                            # scalar
            out_ref[...] = jnp.zeros_like(out_ref) + q                    # lane bcast

    # VMEM budget (double-buffered blocks + scratch), used to set an explicit
    # scoped-VMEM limit that is safe on v5e/v6e/v7x.
    est_bytes = (
        2 * R * tS * LANE * h_itemsize          # hessian block, 2 buffers
        + 2 * 2 * tS * LANE * x_itemsize        # x and x_hat blocks, 2 buffers each
        + 2 * LANE * 4                          # output block, 2 buffers
        + R * LANE * 4                          # accumulator scratch
    )
    vmem_limit = int(max(32 << 20, min(64 << 20, 2 * est_bytes)))

    return pl.pallas_call(
        kernel,
        out_shape=jax.ShapeDtypeStruct((B, 1, LANE), jnp.float32),
        grid_spec=pltpu.PrefetchScalarGridSpec(
            num_scalar_prefetch=0,
            grid=(B, n_s),
            in_specs=[
                pl.BlockSpec((1, tS, LANE), lambda b, j: (b, j, 0)),
                pl.BlockSpec((1, tS, LANE), lambda b, j: (b, j, 0)),
                pl.BlockSpec((1, R, tS, LANE), lambda b, j: (b, 0, j, 0)),
            ],
            out_specs=pl.BlockSpec((1, 1, LANE), lambda b, j: (b, 0, 0)),
            scratch_shapes=[pltpu.VMEM((R, LANE), jnp.float32)],
        ),
        compiler_params=pltpu.CompilerParams(
            dimension_semantics=("parallel", "arbitrary"),
            vmem_limit_bytes=vmem_limit,
        ),
    )(x3, xh3, h4)


# ----------------------------------------------------------------------------
# bpp kernel: single gridded reduction over all likelihood tensors.
# ----------------------------------------------------------------------------
def _bpp_pallas(likelihoods, num_pixels):
    """sum_i sum(log(lik_i)) / (-log 2 * num_pixels) via one blocked reduction."""
    scale = 1.0 / (-math.log(2.0) * float(num_pixels))

    flats = [l.reshape(-1) for l in likelihoods]
    flat = flats[0] if len(flats) == 1 else jnp.concatenate(flats)
    n = flat.shape[0]

    rows_needed = -(-n // LANE)
    t_rows = 512 if rows_needed >= 512 else int(-(-rows_needed // 8) * 8)
    total_rows = int(-(-rows_needed // t_rows) * t_rows)
    pad = total_rows * LANE - n
    if pad:
        flat = jnp.concatenate([flat, jnp.ones((pad,), flat.dtype)])  # log(1)=0
    a = flat.reshape(total_rows, LANE)
    n_tiles = total_rows // t_rows

    def kernel(l_ref, o_ref, acc_ref):
        i = pl.program_id(0)

        @pl.when(i == 0)
        def _():
            acc_ref[...] = jnp.zeros_like(acc_ref)

        acc_ref[...] += jnp.sum(jnp.log(l_ref[...].astype(jnp.float32)))

        @pl.when(i == pl.num_programs(0) - 1)
        def _():
            o_ref[...] = acc_ref[...] * scale

    out = pl.pallas_call(
        kernel,
        out_shape=jax.ShapeDtypeStruct((1, 1), jnp.float32),
        grid_spec=pltpu.PrefetchScalarGridSpec(
            num_scalar_prefetch=0,
            grid=(n_tiles,),
            in_specs=[pl.BlockSpec((t_rows, LANE), lambda i: (i, 0))],
            out_specs=pl.BlockSpec((1, 1), lambda i: (0, 0)),
            scratch_shapes=[pltpu.VMEM((1, 1), jnp.float32)],
        ),
        compiler_params=pltpu.CompilerParams(dimension_semantics=("arbitrary",)),
    )(a)
    return out[0, 0]


# ----------------------------------------------------------------------------
# ProxyHessLoss forward
# ----------------------------------------------------------------------------
def proxy_hess_loss(data, output, std, lmbda=0.01):
    x = output["x"]
    x_hat = output["x_hat"]
    B = x.shape[0]
    num_pixels = x.size                 # output['x'].numel()
    N = num_pixels // B                 # per-sample flattened size

    hess = data["hesseigen"]
    P, Q = hess.shape[-2], hess.shape[-1]
    h = hess.reshape(B, -1, P * Q)      # flatten(start_dim=-2)
    R = h.shape[1]
    if h.shape[-1] != N:
        raise ValueError("hesseigen inner size must match per-sample numel of x")

    # NO wrapper-side upcast: keep native dtype (bf16/f32); cast inside kernel.
    xf = x.reshape(B, N)
    xhf = x_hat.reshape(B, N)
    pad = (-N) % LANE
    if pad:  # zero-pad the feature axis; zero d rows contribute nothing.
        xf = jnp.pad(xf, ((0, 0), (0, pad)))
        xhf = jnp.pad(xhf, ((0, 0), (0, pad)))
        h = jnp.pad(h, ((0, 0), (0, 0), (0, pad)))
    S = (N + pad) // LANE

    x3 = xf.reshape(B, S, LANE)
    xh3 = xhf.reshape(B, S, LANE)
    h4 = h.reshape(B, R, S, LANE)

    quads = _recon_quad_pallas(x3, xh3, h4)                  # (B, 1, 128)
    recon_loss = (
        jnp.sum(quads[:, 0, 0]) * (1.0 / (float(B) * float(std) ** 2))
    ).reshape(1, 1)                                          # matches .mean(dim=0)

    bpp_loss = _bpp_pallas(list(output["likelihoods"].values()), num_pixels)

    return {
        "recon_loss": recon_loss,
        "bpp_loss": bpp_loss,
        "loss": lmbda * recon_loss + bpp_loss,
    }


# ----------------------------------------------------------------------------
# Pure-JAX reference for verification.
# ----------------------------------------------------------------------------
def _reference(data, output, std, lmbda):
    x = output["x"]
    x_hat = output["x_hat"]
    B = x.shape[0]
    num_pixels = x.size
    hess = data["hesseigen"]
    h = hess.reshape(B, -1, hess.shape[-2] * hess.shape[-1]).astype(jnp.float32)
    d = (x.astype(jnp.float32) - x_hat.astype(jnp.float32)).reshape(B, 1, -1)
    q = d @ jnp.swapaxes(h, -1, -2) @ h @ jnp.swapaxes(d, -1, -2)      # (B,1,1)
    recon = jnp.mean(q, axis=0) / (std ** 2)
    bpp = sum(
        jnp.sum(jnp.log(l.astype(jnp.float32))) / (-math.log(2) * num_pixels)
        for l in output["likelihoods"].values()
    )
    return {"recon_loss": recon, "bpp_loss": bpp, "loss": lmbda * recon + bpp}


if __name__ == "__main__":
    key = jax.random.PRNGKey(0)
    k1, k2, k3, k4, k5 = jax.random.split(key, 5)

    B, C, H, W = 2, 4, 16, 16          # x: (2, 4, 16, 16)  -> N = 1024 / sample
    R = 8                              # hesseigen rank
    std = 1.5
    lmbda = 0.01

    x = jax.random.normal(k1, (B, C, H, W), jnp.float32)
    x_hat = x + 0.1 * jax.random.normal(k2, (B, C, H, W), jnp.float32)
    # hesseigen (B, R, 32, 32): flatten(start_dim=-2) -> (B, R, 1024)
    hesseigen = jax.random.normal(k3, (B, R, 32, 32), jnp.float32)
    lik_y = jax.random.uniform(k4, (B, 8, 8, 8), jnp.float32, minval=0.05, maxval=1.0)
    lik_z = jax.random.uniform(k5, (B, 4, 4, 8), jnp.float32, minval=0.05, maxval=1.0)

    data = {"hesseigen": hesseigen}
    output = {"x": x, "x_hat": x_hat, "likelihoods": {"y": lik_y, "z": lik_z}}

    out = proxy_hess_loss(data, output, std=std, lmbda=lmbda)
    jax.block_until_ready(out["loss"])

    ref = _reference(data, output, std, lmbda)
    np.testing.assert_allclose(np.asarray(out["recon_loss"]),
                               np.asarray(ref["recon_loss"]), rtol=1e-4, atol=1e-4)
    np.testing.assert_allclose(np.asarray(out["bpp_loss"]),
                               np.asarray(ref["bpp_loss"]), rtol=1e-4, atol=1e-4)
    np.testing.assert_allclose(np.asarray(out["loss"]),
                               np.asarray(ref["loss"]), rtol=1e-4, atol=1e-4)

    # bf16 path: native-dtype inputs go straight to HBM/kernel, cast happens
    # inside the kernel body (the intended low-bandwidth configuration).
    data_bf = {"hesseigen": hesseigen.astype(jnp.bfloat16)}
    output_bf = {
        "x": x.astype(jnp.bfloat16),
        "x_hat": (x + 0.1 * jax.random.normal(k2, (B, C, H, W))).astype(jnp.bfloat16),
        "likelihoods": {"y": lik_y, "z": lik_z},
    }
    out_bf = proxy_hess_loss(data_bf, output_bf, std=std, lmbda=lmbda)
    jax.block_until_ready(out_bf["loss"])
    ref_bf = _reference(data_bf, output_bf, std, lmbda)
    np.testing.assert_allclose(np.asarray(out_bf["recon_loss"]),
                               np.asarray(ref_bf["recon_loss"]), rtol=2e-3, atol=2e-3)
    np.testing.assert_allclose(np.asarray(out_bf["loss"]),
                               np.asarray(ref_bf["loss"]), rtol=2e-3, atol=2e-3)

    print("KERNEL_OK")
</pallas_src>

<mosaic_0001>
module attributes {stable_mosaic.version = 11 : i64} {
  func.func @kernel(%arg0: i32, %arg1: i32, %arg2: memref<1x8x128xf32, #tpu.memory_space<vmem>>, %arg3: memref<1x8x128xf32, #tpu.memory_space<vmem>>, %arg4: memref<1x8x8x128xf32, #tpu.memory_space<vmem>>, %arg5: memref<1x1x128xf32, #tpu.memory_space<vmem>>, %arg6: memref<8x128xf32, #tpu.memory_space<vmem>>) attributes {dimension_semantics = [#tpu.dimension_semantics<parallel>, #tpu.dimension_semantics<arbitrary>], iteration_bounds = array<i64: 2, 1>, scalar_prefetch = 0 : i64, scratch_operands = 1 : i64, tpu.core_type = #tpu.core_type<tc>, window_params = [{transform_indices = @transform_0, window_bounds = array<i64: 1, 8, 128>}, {transform_indices = @transform_1, window_bounds = array<i64: 1, 8, 128>}, {transform_indices = @transform_2, window_bounds = array<i64: 1, 8, 8, 128>}, {transform_indices = @transform_3, window_bounds = array<i64: 1, 1, 128>}]} {
    %c0_i32 = arith.constant 0 : i32
    %0 = arith.cmpi eq, %arg1, %c0_i32 : i32
    %1 = arith.extui %0 : i1 to i32
    %c0_i32_0 = arith.constant 0 : i32
    %2 = arith.cmpi ne, %1, %c0_i32_0 : i32
    scf.if %2 {
      %cst_16 = arith.constant 0.000000e+00 : f32
      %20 = vector.broadcast %cst_16 : f32 to vector<8x128xf32>
      %c0_17 = arith.constant 0 : index
      %c0_18 = arith.constant 0 : index
      %21 = vector.load %arg6[%c0_17, %c0_18] : memref<8x128xf32, #tpu.memory_space<vmem>>, vector<8x128xf32>
      tpu.vector_store %arg6[%c0_17, %c0_18], %20 {strides = array<i32>} : memref<8x128xf32, #tpu.memory_space<vmem>>, vector<8x128xf32>,
    } else {
    }
    %c0 = arith.constant 0 : index
    %c0_1 = arith.constant 0 : index
    %c0_2 = arith.constant 0 : index
    %3 = vector.load %arg2[%c0, %c0_1, %c0_2] : memref<1x8x128xf32, #tpu.memory_space<vmem>>, vector<1x8x128xf32>
    %4 = vector.shape_cast %3 : vector<1x8x128xf32> to vector<8x128xf32>
    %c0_3 = arith.constant 0 : index
    %c0_4 = arith.constant 0 : index
    %c0_5 = arith.constant 0 : index
    %5 = vector.load %arg3[%c0_3, %c0_4, %c0_5] : memref<1x8x128xf32, #tpu.memory_space<vmem>>, vector<1x8x128xf32>
    %6 = vector.shape_cast %5 : vector<1x8x128xf32> to vector<8x128xf32>
    %7 = arith.subf %4, %6 : vector<8x128xf32>
    %c0_6 = arith.constant 0 : index
    %c0_7 = arith.constant 0 : index
    %c0_8 = arith.constant 0 : index
    %c0_9 = arith.constant 0 : index
    %8 = vector.load %arg4[%c0_6, %c0_7, %c0_8, %c0_9] : memref<1x8x8x128xf32, #tpu.memory_space<vmem>>, vector<1x8x8x128xf32>
    %9 = vector.shape_cast %8 : vector<1x8x8x128xf32> to vector<8x8x128xf32>
    %c0_10 = arith.constant 0 : index
    %c0_11 = arith.constant 0 : index
    %10 = vector.load %arg6[%c0_10, %c0_11] : memref<8x128xf32, #tpu.memory_space<vmem>>, vector<8x128xf32>
    %11 = vector.shape_cast %7 : vector<8x128xf32> to vector<1x8x128xf32>
    %12 = vector.broadcast %11 : vector<1x8x128xf32> to vector<8x8x128xf32>
    %13 = arith.mulf %9, %12 : vector<8x8x128xf32>
    %cst = arith.constant dense<0.000000e+00> : vector<8x128xf32>
    %14 = vector.multi_reduction <add>, %13, %cst [1] : vector<8x8x128xf32> to vector<8x128xf32>
    %15 = arith.addf %10, %14 : vector<8x128xf32>
    %c0_12 = arith.constant 0 : index
    %c0_13 = arith.constant 0 : index
    %16 = vector.load %arg6[%c0_12, %c0_13] : memref<8x128xf32, #tpu.memory_space<vmem>>, vector<8x128xf32>
    tpu.vector_store %arg6[%c0_12, %c0_13], %15 {strides = array<i32>} : memref<8x128xf32, #tpu.memory_space<vmem>>, vector<8x128xf32>,
    %c0_i32_14 = arith.constant 0 : i32
    %17 = arith.cmpi eq, %arg1, %c0_i32_14 : i32
    %18 = arith.extui %17 : i1 to i32
    %c0_i32_15 = arith.constant 0 : i32
    %19 = arith.cmpi ne, %18, %c0_i32_15 : i32
    scf.if %19 {
      %c0_16 = arith.constant 0 : index
      %c0_17 = arith.constant 0 : index
      %20 = vector.load %arg6[%c0_16, %c0_17] : memref<8x128xf32, #tpu.memory_space<vmem>>, vector<8x128xf32>
      %cst_18 = arith.constant dense<0.000000e+00> : vector<8xf32>
      %21 = vector.multi_reduction <add>, %20, %cst_18 [1] : vector<8x128xf32> to vector<8xf32>
      %22 = vector.shape_cast %21 : vector<8xf32> to vector<8x1xf32>
      %23 = arith.mulf %22, %22 : vector<8x1xf32>
      %24 = vector.shape_cast %23 : vector<8x1xf32> to vector<1x8x1xf32>
      %cst_19 = arith.constant dense<0.000000e+00> : vector<1xf32>
      %25 = vector.multi_reduction <add>, %24, %cst_19 [1, 2] : vector<1x8x1xf32> to vector<1xf32>
      %26 = vector.shape_cast %25 : vector<1xf32> to vector<1x1x1xf32>
      %27 = vector.extract %26[0, 0, 0] : f32 from vector<1x1x1xf32>
      %cst_20 = arith.constant 0.000000e+00 : f32
      %28 = vector.broadcast %cst_20 : f32 to vector<1x1x128xf32>
      %29 = vector.broadcast %27 : f32 to vector<1x1x128xf32>
      %30 = arith.addf %28, %29 : vector<1x1x128xf32>
      %c0_21 = arith.constant 0 : index
      %c0_22 = arith.constant 0 : index
      %c0_23 = arith.constant 0 : index
      %31 = vector.load %arg5[%c0_21, %c0_22, %c0_23] : memref<1x1x128xf32, #tpu.memory_space<vmem>>, vector<1x1x128xf32>
      tpu.vector_store %arg5[%c0_21, %c0_22, %c0_23], %30 {strides = array<i32>} : memref<1x1x128xf32, #tpu.memory_space<vmem>>, vector<1x1x128xf32>,
    } else {
    }
    return
  }
  func.func @transform_0(%arg0: i32, %arg1: i32) -> (i32, i32, i32) {
    %c0_i32 = arith.constant 0 : i32
    %c0_i32_0 = arith.constant 0 : i32
    return %arg0, %arg1, %c0_i32 : i32, i32, i32
  }
  func.func @transform_1(%arg0: i32, %arg1: i32) -> (i32, i32, i32) {
    %c0_i32 = arith.constant 0 : i32
    %c0_i32_0 = arith.constant 0 : i32
    return %arg0, %arg1, %c0_i32 : i32, i32, i32
  }
  func.func @transform_2(%arg0: i32, %arg1: i32) -> (i32, i32, i32, i32) {
    %c0_i32 = arith.constant 0 : i32
    %c0_i32_0 = arith.constant 0 : i32
    %c0_i32_1 = arith.constant 0 : i32
    return %arg0, %c0_i32, %arg1, %c0_i32_0 : i32, i32, i32, i32
  }
  func.func @transform_3(%arg0: i32, %arg1: i32) -> (i32, i32, i32) {
    %c0_i32 = arith.constant 0 : i32
    %c0_i32_0 = arith.constant 0 : i32
    %c0_i32_1 = arith.constant 0 : i32
    return %arg0, %c0_i32, %c0_i32_0 : i32, i32, i32
  }
}

</mosaic_0001>

<bundles_post_ra>
// kernel: tpu_custom_call.1
= control target key start
LH: loop header
LB: loop body
LE: loop exit
PB: predicated region body
PF: predicated region fallthrough
CT: control target
= control target key end

     0   :  { %s1098_s0 = inlined_call_operand.hbm [shape: f32[2,8,128], index: 0, kind: input, shape index: {}]   ;;  %s1099_s1 = inlined_call_operand.hbm [shape: f32[2,8,128], index: 1, kind: input, shape index: {}]   ;;  %s1100_s2 = inlined_call_operand.hbm [shape: f32[2,8,8,128], index: 2, kind: input, shape index: {}]   ;;  %s1101_s3 = inlined_call_operand.hbm [shape: f32[2,1,128], index: 3, kind: output, shape index: {}]  }
   0x1   :  { %1107 = sst [smem:[#allocation16_spill]] %s1099_s1 }
   0x2   :  { %8 = vsyncpa [#allocation4], 0 }
   0x3   :  { %10 = vsyncpa [#allocation4 + $0x1], 0 }
   0x4   :  { %11 = vsyncpa [#allocation7], 0 }
   0x5   :  { %13 = vsyncpa [#allocation7 + $0x1], 0 }
   0x6   :  { %14 = vsyncpa [#allocation5], 0 }
   0x7   :  { %16 = vsyncpa [#allocation5 + $0x1], 0  ;;  %s832_s12 = smov 0   ;;  %s834_s13 = smov 0  }
   0x8   :  { %s836_s14 = smov 0   ;;  %s838_s15 = smov 0  }
   0x9   :  { %s840_s16 = smov 0   ;;  %s842_s17 = smov 0  }
   0xa LB: > { %1108 = sst [smem:[#allocation13_spill]] %s792_s14  ;;  %s863_s18 = sadd.s32 4294967295, %s804_s17   ;;  %s804_s17 = sphi %s842_s17, %s22_s17   ;;  %s800_s16 = sphi %s840_s16, %s1131_s16   ;;  %s796_s15 = sphi %s838_s15, %s1130_s15   ;;  %s792_s14 = sphi %s836_s14, %s1126_s14   ;;  %s788_s13 = sphi %s834_s13, %s1129_s13   ;;  %s784_s12 = sphi %s832_s12, %s1128_s12  }
   0xb   : > { %s534_s19 = sadd.s32 4294967294, %s804_s17   ;;  %s34_s20 = sadd.s32 1, %s800_s16 }
   0xc   : > { %s43_s21 = sadd.s32 1, %s792_s14  ;;  %p36_p0 = scmp.ge.s32.totalorder %s34_s20, 2 }
   0xd   : > { %p50_p1 = scmp.ne.s32.totalorder %s792_s14, %s788_s13  ;;  %p51_p2 = scmp.eq.s32.totalorder %s804_s17, 0 }
   0xe   : > { %p56_p3 = scmp.ne.s32.totalorder %s788_s13, %s784_s12  ;;  %s1133_s20 = smov (%p36_p0, %s34_s20), 0 }
   0xf   : > { %1109 = sst [smem:[#allocation14_spill]] %s1133_s20  ;;  %p875_p4 = por %p51_p2, %p50_p1 }
  0x10   : > { %p57_p5 = scmp.eq.s32.totalorder %s863_s18, 0  ;;  %s38_s23 = ssub.s32 %s800_s16, %s1133_s20 }
  0x11   : > { %p136_p6 = scmp.eq.s32.totalorder %s863_s18, 1  ;;  %p41_p7 = scmp.eq.s32.totalorder %s38_s23, 0 }
  0x12   : > { %p883_p8 = por %p57_p5, %p56_p3  ;;  %p142_p10 = scmp.eq.s32.totalorder %s534_s19, 1 }
  0x13   : > { %p887_p9 = por %p136_p6, %p50_p1  ;;  %p576_p13 = scmp.lt.s32.totalorder %s804_s17, 2 }
  0x14   : > { %s1111_s24 = scalar_select %p883_p8, 1, 0 }
  0x15   : > { %s1112_s25 = scalar_select %p887_p9, 1, 0 }
  0x16   : > { %s892_s26 = scalar_select %p41_p7, %s792_s14, %s43_s21  }
  0x17   : > { %p894_p11 = por %p142_p10, %p56_p3  ;;  %s901_s28 = sand.u32 1, %s792_s14  }
  0x18   : > { %1113 = sst [smem:[#allocation15_spill]] %s892_s26  ;;  %s1102_s29 = sshll.u32 %s901_s28, 3 }
  0x19   : > { %s1114_s27 = scalar_select %p894_p11, 1, 0 }
  0x1a   : > { %s538_s30 = sshll.u32 %s800_s16, 7  ;;  %p907_p0 = pnand %p576_p13, %p875_p4 }
  0x1b   : > { %s181_s5 = sand.u32 1, %s804_s17   ;;  %s1116_s1 = sld [smem:[#allocation16_spill]] }
  0x1c   : > { %s185_s9 = scalar_lea.vmem [#allocation6], %s1102_s29  ;;  %s541_s11 = sshll.u32 %s901_s28, 6 }
  0x1d   : > { %s193_s10 = sshll.u32 %s185_s9, 4  ;;  %s924_s19 = scalar_lea.sflag [#allocation7], %s181_s5  ;;  %s922_s10 = int_to_ptr.vmem [resolvable:$true] %s193_s10 }
  0x1e   : > { %p930_p2 = pneg %p907_p0 }
  0x21   : > { %s917_s8 = scalar_lea.hbm %s1116_s1, %s538_s30  ;;  %s633_s7 = scalar_lea.hbm %s1116_s1, 256 }
  0x22   : > { %s628_s21 = scalar_lea.hbm %s917_s8, 128  ;;  %p634_p5 = scmp.lt.u32.totalorder %s917_s8, %s1116_s1 }
  0x23   : > { %p629_p1 = scmp.ne.s32.totalorder %s917_s8, %s628_s21  ;;  %p635_p6 = scmp.lt.u32.totalorder %s633_s7, %s628_s21 }
  0x24   : > { %p637_p10 = scmp.lt.u32.totalorder %s628_s21, %s917_s8 }
  0x25   : > { %p631_p3 = pnand %p930_p2, %p629_p1  ;;  %p636_p7 = por %p635_p6, %p634_p5 }
  0x27   : > { %p632_p4 = pneg %p631_p3  ;;  %p638_p13 = por %p637_p10, %p636_p7 }
  0x29   : > { %p639_p12 = pnand %p638_p13, %p632_p4 }
  0x2b   : > { %642 = shalt.err (!%p639_p12)
}
  0x2c   : > { %s643_s5 = scalar_lea.vmem %s922_s10, 128  ;;  %s806_s23 = smov [#allocation6]  }
  0x2d   : > { %p644_p1 = scmp.ne.s32.totalorder %s922_s10, %s643_s5  ;;  %s648_s6 = sshll.u32 %s806_s23, 4  ;;  %s649_s6 = int_to_ptr.vmem [resolvable:$false] %s648_s6 }
  0x2e   : > { %s650_s29 = scalar_lea.vmem %s649_s6, 256  ;;  %p651_p9 = scmp.lt.s32.totalorder %s922_s10, %s649_s6 }
  0x2f   : > { %p646_p3 = pnand %p644_p1, %p930_p2  ;;  %p652_p8 = scmp.lt.s32.totalorder %s650_s29, %s643_s5 }
  0x31   : > { %p647_p11 = pneg %p646_p3  ;;  %p653_p5 = por %p652_p8, %p651_p9 }
  0x33   : > { %p654_p6 = pnand %p653_p5, %p647_p11 }
  0x35   : > { %657 = shalt.err (!%p654_p6)
}
  0x36   : > { %568 = dma.hbm_to_vmem [thread:$0]  (!%p907_p0), %s917_s8, 128, %s922_s10, %s924_s19  }
  0x37   : > { %s204_s21 = scalar_lea.vmem [#allocation8], %s541_s11  ;;  %p544_p8 = scmp.ge.s32.totalorder %s804_s17, 1 }
  0x38   : > { %s212_s7 = sshll.u32 %s204_s21, 4  ;;  %p220_p9 = scmp.lt.s32.totalorder %s804_s17, 3  ;;  %s957_s7 = int_to_ptr.vmem [resolvable:$true] %s212_s7 }
  0x39   : > { %s969_s6 = scalar_lea.hbm %s1098_s0, %s538_s30  ;;  %s1119_s29 = sshll.u32 %s901_s28, 3 }
  0x3a   : > { %p960_p11 = pnand %p544_p8, %p220_p9  ;;  %s166_s8 = scalar_lea.vmem [#allocation3], %s1119_s29 }
  0x3b   : > { %s174_s10 = sshll.u32 %s166_s8, 4  ;;  %s551_s11 = sshll.u32 %s800_s16, 10  ;;  %s974_s10 = int_to_ptr.vmem [resolvable:$true] %s174_s10 }
  0x3c   : > { %s1118_s9 = scalar_select %p960_p11, 1, 0 }
  0x3d   : > { %s979_s20 = scalar_lea.hbm %s1100_s2, %s551_s11  ;;  %s163_s26 = scalar_lea.sflag [#allocation4], %s901_s28 }
  0x3e   : > { %s658_s14 = scalar_lea.hbm %s969_s6, 128  ;;  %s663_s23 = scalar_lea.hbm %s1098_s0, 256 }
  0x3f   : > { %p659_p12 = scmp.ne.s32.totalorder %s969_s6, %s658_s14  ;;  %p664_p10 = scmp.lt.u32.totalorder %s969_s6, %s1098_s0 }
  0x40   : > { %p665_p13 = scmp.lt.u32.totalorder %s663_s23, %s658_s14  ;;  %p667_p3 = scmp.lt.u32.totalorder %s658_s14, %s969_s6 }
  0x41   : > { %p661_p4 = pnand %p659_p12, %p930_p2 }
  0x42   : > { %p666_p1 = por %p665_p13, %p664_p10 }
  0x43   : > { %p662_p7 = pneg %p661_p4 }
  0x44   : > { %p668_p5 = por %p667_p3, %p666_p1 }
  0x46   : > { %p669_p6 = pnand %p668_p5, %p662_p7 }
  0x48   : > { %672 = shalt.err (!%p669_p6)
}
  0x49   : > { %s673_s1 = scalar_lea.vmem %s974_s10, 128  ;;  %s807_s28 = smov [#allocation3]  }
  0x4a   : > { %p674_p8 = scmp.ne.s32.totalorder %s974_s10, %s673_s1  ;;  %s678_s11 = sshll.u32 %s807_s28, 4  ;;  %s679_s11 = int_to_ptr.vmem [resolvable:$false] %s678_s11 }
  0x4b   : > { %s680_s21 = scalar_lea.vmem %s679_s11, 256  ;;  %p681_p4 = scmp.lt.s32.totalorder %s974_s10, %s679_s11 }
  0x4c   : > { %p676_p9 = pnand %p674_p8, %p930_p2  ;;  %p682_p11 = scmp.lt.s32.totalorder %s680_s21, %s673_s1 }
  0x4e   : > { %p677_p12 = pneg %p676_p9  ;;  %p683_p10 = por %p682_p11, %p681_p4 }
  0x50   : > { %p684_p13 = pnand %p683_p10, %p677_p12 }
  0x52   : > { %687 = shalt.err (!%p684_p13)
}
  0x53   : > { %565 = dma.hbm_to_vmem [thread:$0]  (!%p907_p0), %s969_s6, 128, %s974_s10, %s163_s26  }
  0x54   : > { %s688_s14 = scalar_lea.hbm %s979_s20, 1024  ;;  %s693_s23 = scalar_lea.hbm %s1100_s2, 2048 }
  0x55   : > { %p689_p7 = scmp.ne.s32.totalorder %s979_s20, %s688_s14  ;;  %p694_p11 = scmp.lt.u32.totalorder %s979_s20, %s1100_s2 }
  0x56   : > { %p695_p5 = scmp.lt.u32.totalorder %s693_s23, %s688_s14  ;;  %p697_p8 = scmp.lt.u32.totalorder %s688_s14, %s979_s20 }
  0x57   : > { %p691_p1 = pnand %p689_p7, %p930_p2 }
  0x58   : > { %p696_p6 = por %p695_p5, %p694_p11 }
  0x59   : > { %p692_p3 = pneg %p691_p1 }
  0x5a   : > { %p698_p9 = por %p697_p8, %p696_p6 }
  0x5c   : > { %p699_p12 = pnand %p698_p9, %p692_p3 }
  0x5e   : > { %702 = shalt.err (!%p699_p12)
}
  0x5f   : > { %s703_s26 = scalar_lea.vmem %s957_s7, 1024  ;;  %s808_s6 = smov [#allocation8]  }
  0x60   : > { %p704_p4 = scmp.ne.s32.totalorder %s957_s7, %s703_s26  ;;  %s708_s10 = sshll.u32 %s808_s6, 4  ;;  %s709_s10 = int_to_ptr.vmem [resolvable:$false] %s708_s10 }
  0x61   : > { %s710_s1 = scalar_lea.vmem %s709_s10, 2048  ;;  %p711_p7 = scmp.lt.s32.totalorder %s957_s7, %s709_s10 }
  0x62   : > { %p706_p10 = pnand %p704_p4, %p930_p2  ;;  %p712_p1 = scmp.lt.s32.totalorder %s710_s1, %s703_s26 }
  0x64   : > { %p707_p13 = pneg %p706_p10  ;;  %p713_p11 = por %p712_p1, %p711_p7 }
  0x66   : > { %p714_p5 = pnand %p713_p11, %p707_p13 }
  0x68   : > { %717 = shalt.err (!%p714_p5)
}
  0x69   : > { %s809_s28 = smov 128   ;;  %s810_s11 = smov 8  }
  0x6a   : > { %571 = dma.hbm_to_vmem [thread:$0]  (!%p907_p0), %s979_s20, 1024, %s957_s7, %s924_s19, %s809_s28, %s809_s28, %s810_s11  }
  0x6b   : > { %p1120_p2 = scmp.ne.s32.totalorder %s1118_s9, 0 }
  0x6c   : > { %s1028_s22 = sand.u32 (!%p1120_p2), 1, %s788_s13   ;;  %p1121_p3 = scmp.ne.s32.totalorder (!%p1120_p2), %s1111_s24, 0 }
  0x6d   : > { %224 = sbr.rel (%p1120_p2) target bundleno = 508 (0x1fc), region = 32  ;;  %s545_s21 = sshll.u32 (!%p1120_p2), %s1028_s22, 3 }
  0x6e   : > { %s227_s14 = scalar_lea.sflag (!%p1120_p2), [#allocation4], %s1028_s22  ;;  %s230_s30 = scalar_lea.vmem (!%p1120_p2), [#allocation3], %s545_s21 }
  0x74   : > { %771 = dma.done.wait (%p1121_p3), %s227_s14, 128  }
  0x75   : > { %773 = vsyncadd (%p1121_p3), %s227_s14, 4294967168  ;;  %s235_s20 = sand.u32 1, %s863_s18   ;;  %s239_s19 = scalar_lea.vmem [#allocation6], %s545_s21 }
  0x76   : > { %s236_s4 = scalar_lea.sflag [#allocation7], %s235_s20 }
  0x77   : > { %775 = dma.done.wait (%p1121_p3), %s236_s4, 1152  }
  0x78   : > { %777 = vsyncadd (%p1121_p3), %s236_s4, 4294966144  ;;  %s547_s7 = sshll.u32 %s1028_s22, 6  ;;  %v285_v0 = vld [vmem:[%s230_s30] sm:$0xff]  ;;  %v286_v1 = vld [vmem:[%s239_s19] sm:$0xff]  ;;  %vm361_vm0 = vcmask 1041409   ;;  %vm363_vm1 = vcmask 1042434  }
  0x79   : > { %s248_s9 = scalar_lea.vmem [#allocation8], %s547_s7  ;;  %v287_v3 = vsub.f32 %v285_v0, %v286_v1  ;;  %vm365_vm2 = vcmask 1043459   ;;  %vm367_vm3 = vcmask 1044484   ;;  %vm369_vm4 = vcmask 1045509   ;;  %s279_s18 = scalar_lea.vmem [#allocation9], %s1028_s22 }
  0x7a   : > { %v288_v2 = vld [vmem:[%s248_s9] sm:$0xff]  ;;  %v289_v4 = vld [vmem:[%s248_s9 + $0x8] sm:$0xff]  ;;  %v290_v5 = vld [vmem:[%s248_s9 + $0x10] sm:$0xff]  ;;  %vm371_vm5 = vcmask 1046534   ;;  %vm373_vm6 = vcmask 1047559   ;;  %vm385_vm7 = vcmask 7168  }
  0x7b   : > { %v291_v6 = vld [vmem:[%s248_s9 + $0x18] sm:$0xff]  ;;  %v292_v7 = vld [vmem:[%s248_s9 + $0x20] sm:$0xff]  ;;  %v293_v8 = vld [vmem:[%s248_s9 + $0x28] sm:$0xff]  ;;  %v297_v11 = vmul.f32 %v288_v2, %v287_v3  ;;  %v298_v12 = vmul.f32 %v289_v4, %v287_v3  ;;  %v299_v13 = vmul.f32 %v290_v5, %v287_v3  ;;  %s412_s24 = sshll.u32 %s279_s18, 4  ;;  %s548_s5 = sshll.u32 %s796_s15, 4  ;;  %s1046_s24 = int_to_ptr.vmem [resolvable:$true] %s412_s24 }
  0x7c   : > { %v294_v9 = vld [vmem:[%s248_s9 + $0x30] sm:$0xff]  ;;  %v295_v10 = vld [vmem:[%s248_s9 + $0x38] sm:$0xff]  ;;  %v300_v14 = vmul.f32 %v291_v6, %v287_v3  ;;  %v301_v15 = vmul.f32 %v292_v7, %v287_v3  ;;  %v302_v16 = vmul.f32 %v293_v8, %v287_v3  ;;  %s1051_s26 = scalar_lea.hbm %s1101_s3, %s548_s5  ;;  %s400_s6 = scalar_lea.sflag [#allocation5], %s1028_s22 }
  0x7d   : > { %v303_v17 = vmul.f32 %v294_v9, %v287_v3  ;;  %v304_v18 = vmul.f32 %v295_v10, %v287_v3  ;;  %v305_v19 = vrot.slane %v297_v11, 4  ;;  %v311_v20 = vrot.slane %v298_v12, 4  ;;  %s718_s10 = scalar_lea.vmem %s1046_s24, 16  ;;  %p1122_p6 = scmp.ne.s32.totalorder %s1112_s25, 0 }
  0x7e   : > { %v317_v21 = vrot.slane %v299_v13, 4  ;;  %v323_v22 = vrot.slane %v300_v14, 4  ;;  %v329_v23 = vrot.slane %v301_v15, 4  ;;  %v335_v24 = vrot.slane %v302_v16, 4  ;;  %p719_p0 = scmp.ne.s32.totalorder %s1046_s24, %s718_s10  ;;  %s811_s15 = smov [#allocation9]  }
  0x7f   : > { %v341_v25 = vrot.slane %v303_v17, 4  ;;  %v347_v26 = vrot.slane %v304_v18, 4  ;;  %v306_v27 = vadd.f32 %v305_v19, %v297_v11  ;;  %v312_v28 = vadd.f32 %v311_v20, %v298_v12  ;;  %s722_s1 = sshll.u32 %s811_s15, 4  ;;  %s723_s1 = int_to_ptr.vmem [resolvable:$false] %s722_s1 }
  0x80   : > { %v318_v29 = vadd.f32 %v317_v21, %v299_v13  ;;  %v324_v30 = vadd.f32 %v323_v22, %v300_v14  ;;  %v330_v31 = vadd.f32 %v329_v23, %v301_v15  ;;  %v336_v32 = vadd.f32 %v335_v24, %v302_v16  ;;  %p720_p8 = pnand %p719_p0, %p1122_p6  ;;  %s724_s28 = scalar_lea.vmem %s723_s1, 32 }
  0x81   : > { %v342_v33 = vadd.f32 %v341_v25, %v303_v17  ;;  %v348_v34 = vadd.f32 %v347_v26, %v304_v18  ;;  %v307_v35 = vrot.slane %v306_v27, 2  ;;  %v313_v36 = vrot.slane %v312_v28, 2  ;;  %p725_p12 = scmp.lt.s32.totalorder %s1046_s24, %s723_s1  ;;  %p726_p4 = scmp.lt.s32.totalorder %s724_s28, %s718_s10 }
  0x82   : > { %v319_v37 = vrot.slane %v318_v29, 2  ;;  %v325_v38 = vrot.slane %v324_v30, 2  ;;  %v331_v39 = vrot.slane %v330_v31, 2  ;;  %v337_v40 = vrot.slane %v336_v32, 2  ;;  %p721_p9 = pneg %p720_p8 }
  0x83   : > { %v343_v41 = vrot.slane %v342_v33, 2  ;;  %v349_v42 = vrot.slane %v348_v34, 2  ;;  %v308_v43 = vadd.f32 %v307_v35, %v306_v27  ;;  %v314_v44 = vadd.f32 %v313_v36, %v312_v28  ;;  %p727_p10 = por %p726_p4, %p725_p12 }
  0x84   : > { %v320_v45 = vadd.f32 %v319_v37, %v318_v29  ;;  %v326_v46 = vadd.f32 %v325_v38, %v324_v30  ;;  %v332_v47 = vadd.f32 %v331_v39, %v330_v31  ;;  %v338_v48 = vadd.f32 %v337_v40, %v336_v32 }
  0x85   : > { %v344_v49 = vadd.f32 %v343_v41, %v342_v33  ;;  %v350_v50 = vadd.f32 %v349_v42, %v348_v34  ;;  %v309_v51 = vrot.slane %v308_v43, 1  ;;  %v315_v52 = vrot.slane %v314_v44, 1  ;;  %p728_p13 = pnand %p727_p10, %p721_p9 }
  0x86   : > { %v321_v53 = vrot.slane %v320_v45, 1  ;;  %v327_v54 = vrot.slane %v326_v46, 1  ;;  %v333_v55 = vrot.slane %v332_v47, 1  ;;  %v339_v56 = vrot.slane %v338_v48, 1 }
  0x87   : > { %v345_v57 = vrot.slane %v344_v49, 1  ;;  %v351_v58 = vrot.slane %v350_v50, 1  ;;  %v310_v59 = vadd.f32 %v309_v51, %v308_v43  ;;  %v316_v60 = vadd.f32 %v315_v52, %v314_v44 }
  0x88   : > { %v322_v61 = vadd.f32 %v321_v53, %v320_v45  ;;  %v328_v62 = vadd.f32 %v327_v54, %v326_v46  ;;  %v334_v63 = vadd.f32 %v333_v55, %v332_v47  ;;  %v340_v0 = vadd.f32 %v339_v56, %v338_v48 }
  0x89   : > { %v362_v1 = vsel %vm361_vm0, %v316_v60, %v310_v59  ;;  %v346_v2 = vadd.f32 %v345_v57, %v344_v49  ;;  %v352_v4 = vadd.f32 %v351_v58, %v350_v50 }
  0x8a   : > { %v364_v3 = vsel %vm363_vm1, %v322_v61, %v362_v1 }
  0x8b   : > { %v366_v5 = vsel %vm365_vm2, %v328_v62, %v364_v3 }
  0x8c   : > { %v368_v6 = vsel %vm367_vm3, %v334_v63, %v366_v5 }
  0x8d   : > { %v370_v7 = vsel %vm369_vm4, %v340_v0, %v368_v6 }
  0x8e   : > { %v372_v8 = vsel %vm371_vm5, %v346_v2, %v370_v7 }
  0x8f   : > { %v374_v9 = vsel %vm373_vm6, %v352_v4, %v372_v8 }
  0x90   : > { %382 = vadd.xlane.f32.xlu0 %v374_v9 }
 0x11d   : > { %v383_v10 = vpop.xlane.xlu0 %382 }
 0x11e   : > { %v384_v11 = vmul.f32 %v383_v10, %v383_v10 }
 0x120   : > { %v386_v12 = vsel %vm385_vm7, %v384_v11, 0.0 }
 0x121   : > { %387 = vadd.xlane.f32.xlu0 %v386_v12 }
 0x1ae   : > { %v388_v13 = vpop.xlane.xlu0 %387 }
 0x1af   : > { %v389_v14 = vrot.slane %v388_v13, 4 }
 0x1b1   : > { %v390_v15 = vadd.f32 %v389_v14, %v388_v13 }
 0x1b3   : > { %v391_v16 = vrot.slane %v390_v15, 2 }
 0x1b5   : > { %v392_v17 = vadd.f32 %v391_v16, %v390_v15 }
 0x1b7   : > { %v393_v18 = vrot.slane %v392_v17, 1 }
 0x1b9   : > { %v394_v19 = vadd.f32 %v393_v18, %v392_v17 }
 0x1bb   : > { %552 = vpush %v394_v19 }
 0x1ec   : > { %s553_s23 = spop %552 }
 0x1ed   : > { %v396_v20 = vstv %s553_s23 }
 0x1ee   : > { %398 = vst [vmem:[%s279_s18] sm:$0x1] %v396_v20 }
 0x1ef   : > { %731 = shalt.err (!%p728_p13)
}
 0x1f0   : > { %s732_s11 = scalar_lea.hbm %s1051_s26, 16  ;;  %s736_s14 = scalar_lea.hbm %s1101_s3, 32 }
 0x1f1   : > { %p733_p7 = scmp.ne.s32.totalorder %s1051_s26, %s732_s11  ;;  %p737_p5 = scmp.lt.u32.totalorder %s1051_s26, %s1101_s3 }
 0x1f2   : > { %p738_p2 = scmp.lt.u32.totalorder %s736_s14, %s732_s11  ;;  %p740_p0 = scmp.lt.u32.totalorder %s732_s11, %s1051_s26 }
 0x1f3   : > { %p734_p1 = pnand %p733_p7, %p1122_p6 }
 0x1f4   : > { %p739_p3 = por %p738_p2, %p737_p5 }
 0x1f5   : > { %p735_p11 = pneg %p734_p1 }
 0x1f6   : > { %p741_p8 = por %p740_p0, %p739_p3 }
 0x1f8   : > { %p742_p9 = pnand %p741_p8, %p735_p11 }
 0x1fa   : > { %745 = shalt.err (!%p742_p9)
}
 0x1fb   : > { %560 = dma.vmem_to_hbm [thread:$0]  (%p1122_p6), %s1046_s24, 16, %s1051_s26, %s400_s6  }
 0x1fc PF: > { %s424_s4 = sand.u32 1, %s784_s12   ;;  %p1123_p12 = scmp.ne.s32.totalorder %s1114_s27, 0 }
 0x1fd   : > { %p1124_p4 = scmp.ge.s32.totalorder %s804_s17, 2  ;;  %s425_s19 = scalar_lea.sflag [#allocation5], %s424_s4 }
 0x1ff   : > { %p573_p10 = pnand %p1124_p4, %p1123_p12 }
 0x201   : > { %779 = dma.done.wait (!%p573_p10), %s425_s19, 16  }
 0x202   : > { %781 = vsyncadd (!%p573_p10), %s425_s19, 4294967280  ;;  %s22_s17 = sadd.s32 1, %s804_s17   ;;  %s1125_s7 = sld [smem:[#allocation13_spill]] }
 0x203   : > { %p19_p13 = scmp.ge.s32.totalorder %s22_s17, 4   ;;  %s1126_s14 = sld [smem:[#allocation15_spill]] }
 0x204   : > { %s1127_s25 = sld [smem:[#allocation14_spill]]  ;;  %s1128_s12 = smov %s788_s13 }
 0x205   : > { %s1130_s15 = smov %s800_s16  ;;  %21 = sbr.rel (!%p19_p13) target bundleno = 10 (0xa), region = 109 }
 0x208   : > { %s1129_s13 = smov %s1125_s7 }
 0x20a   : > { %s1131_s16 = smov %s1127_s25 }
 0x20c   :  { %429 = vsyncpa [#allocation4], 1 }
 0x20d   :  { %431 = vsyncpa [#allocation4 + $0x1], 1 }
 0x20e   :  { %432 = vsyncpa [#allocation7], 1 }
 0x20f   :  { %434 = vsyncpa [#allocation7 + $0x1], 1 }
 0x210   :  { %435 = vsyncpa [#allocation5], 1 }
 0x211   :  { %437 = vsyncpa [#allocation5 + $0x1], 1 }

</bundles_post_ra>
